<compile_context>
chip_gen: v7x
topology: tpu7x:2x2x1
jax: 0.10.0
libtpu: 0.0.40
codegen_flags: <defaults>
</compile_context>

<pallas_src>
import functools

import jax
import jax.numpy as jnp
from jax.experimental import pallas as pl
from jax.experimental.pallas import tpu as pltpu


# --------------------------------------------------------------------------
# Kernels
# --------------------------------------------------------------------------
def _ca_fused_kernel(x_ref, w1_ref, b1_ref, w2_ref, b2_ref, o_ref, *, inv_s):
    """One block: (Nb, C, S). Fused pool -> gate (ReLU/sigmoid MLP) -> scale."""
    # AdaptiveAvgPool3d(1): mean over the flattened spatial dim (lane reduce),
    # accumulated in f32 straight from the VMEM-resident ref so the whole
    # block value is never held live across the pool->gate->scale chain.
    pooled = jnp.sum(x_ref[...], axis=-1, dtype=jnp.float32) * inv_s      # (Nb, C)

    # Gate MLP (two 1x1x1 convs == per-channel linears).  At these sizes a
    # VPU broadcast-multiply + lane reduce beats 1-column MXU matmuls; switch
    # to lax.dot_general if nb*C*Cr ever grows past ~64K elements.
    w1 = w1_ref[...].astype(jnp.float32)                                   # (Cr, C)
    h = jnp.sum(pooled[:, None, :] * w1[None, :, :], axis=-1)              # (Nb, Cr)
    h = jnp.maximum(h + b1_ref[...].astype(jnp.float32), 0.0)

    w2 = w2_ref[...].astype(jnp.float32)                                   # (C, Cr)
    g = jnp.sum(h[:, None, :] * w2[None, :, :], axis=-1)                   # (Nb, C)
    g = jax.nn.sigmoid(g + b2_ref[...].astype(jnp.float32))

    # Channel-wise rescale (broadcast over S lanes); re-read x_ref instead of
    # reusing a live Python value (avoids block-sized VMEM temp / vreg spill).
    o_ref[...] = (x_ref[...] * g[:, :, None].astype(x_ref.dtype)).astype(o_ref.dtype)


def _pool_partial_kernel(x_ref, sum_ref):
    """Split-S pass 1: accumulate per-(n, C) spatial sums over S tiles."""
    @pl.when(pl.program_id(1) == 0)
    def _():
        sum_ref[...] = jnp.zeros_like(sum_ref)
    sum_ref[...] += jnp.sum(x_ref[...], axis=-1, dtype=jnp.float32)[:, None, :]


def _scale_kernel(x_ref, g_ref, o_ref):
    """Split-S pass 2: rescale an S tile by the per-(n, C) gate."""
    o_ref[...] = (x_ref[...] * g_ref[...].astype(x_ref.dtype)).astype(o_ref.dtype)


# --------------------------------------------------------------------------
# Sizing helpers
# --------------------------------------------------------------------------
def _vmem_capacity_bytes():
    """Physical VMEM per TensorCore (64 MiB v7x, 128 MiB v5e/v6e)."""
    try:
        return int(pltpu.get_tpu_info().vmem_capacity_bytes)
    except Exception:
        return 64 << 20  # conservative fallback (v7x)


def _choose_batch_block(n, per_batch_bytes, target_bytes):
    """Batch rows per block: biggest block <= target_bytes, but keep enough
    (and preferably an even number of) grid steps so both v7x TensorCores get
    work and the DMA pipeline reaches steady state."""
    nb = int(max(1, min(n, target_bytes // max(per_batch_bytes, 1))))
    min_steps = 4 if n >= 4 else min(n, 2)
    while nb > 1 and pl.cdiv(n, nb) < min_steps:
        nb -= 1
    steps = pl.cdiv(n, nb)
    if nb > 1 and steps % 2 == 1:
        nb_alt = pl.cdiv(n, steps + 1)
        if nb_alt >= 1 and pl.cdiv(n, nb_alt) % 2 == 0:
            nb = nb_alt
    return max(nb, 1)


# --------------------------------------------------------------------------
# Split-S fallback (one batch row does not fit the VMEM budget)
# --------------------------------------------------------------------------
def _ca_layer_split_s(x_flat, w1, b1, w2, b2, s_true, vmem_cap,
                      target_block_bytes, itemsize):
    N, C, S0 = x_flat.shape  # S0 already a multiple of 128

    # Spatial tile: multiple of 128, block (1, C, ts) within the VMEM budget.
    ts = max(128, (target_block_bytes // max(C * itemsize, 1)) // 128 * 128)
    ts = min(ts, S0)
    # Pad so ts divides S (zero padding keeps the pooled sums exact; the
    # padded output columns are sliced off afterwards).
    S_pad = pl.cdiv(S0, ts) * ts
    if S_pad != S0:
        x_flat = jnp.pad(x_flat, ((0, 0), (0, 0), (0, S_pad - S0)))
    n_s = S_pad // ts

    block_bytes = C * ts * itemsize
    vmem_limit = int(min(vmem_cap, max(32 << 20, 4 * block_bytes + (4 << 20))))

    # Pass 1: per-(N, C) spatial sums, accumulated over S tiles.
    sums = pl.pallas_call(
        _pool_partial_kernel,
        out_shape=jax.ShapeDtypeStruct((N, 1, C), jnp.float32),
        grid_spec=pltpu.PrefetchScalarGridSpec(
            num_scalar_prefetch=0,
            grid=(N, n_s),
            in_specs=[pl.BlockSpec((1, C, ts), lambda n, s: (n, 0, s))],
            out_specs=pl.BlockSpec((1, 1, C), lambda n, s: (n, 0, 0)),
        ),
        compiler_params=pltpu.CompilerParams(
            dimension_semantics=("parallel", "arbitrary"),
            vmem_limit_bytes=vmem_limit),
        cost_estimate=pl.CostEstimate(
            flops=N * C * S_pad, transcendentals=0,
            bytes_accessed=N * C * S_pad * itemsize),
    )(x_flat)

    # Tiny gate MLP in plain JAX (negligible next to the two streaming passes).
    pooled = sums[:, 0, :] * (1.0 / float(s_true))
    h = jnp.maximum(pooled @ w1.astype(jnp.float32).T + b1.astype(jnp.float32), 0.0)
    g = jax.nn.sigmoid(h @ w2.astype(jnp.float32).T + b2.astype(jnp.float32))
    g = g[:, :, None]  # (N, C, 1) -> per-channel gate in sublane dim

    # Pass 2: re-stream x and scale (accepting the extra read of x).
    out_flat = pl.pallas_call(
        _scale_kernel,
        out_shape=jax.ShapeDtypeStruct((N, C, S_pad), x_flat.dtype),
        grid_spec=pltpu.PrefetchScalarGridSpec(
            num_scalar_prefetch=0,
            grid=(N, n_s),
            in_specs=[pl.BlockSpec((1, C, ts), lambda n, s: (n, 0, s)),
                      pl.BlockSpec((1, C, 1), lambda n, s: (n, 0, 0))],
            out_specs=pl.BlockSpec((1, C, ts), lambda n, s: (n, 0, s)),
        ),
        compiler_params=pltpu.CompilerParams(
            dimension_semantics=("parallel", "arbitrary"),
            vmem_limit_bytes=vmem_limit),
        cost_estimate=pl.CostEstimate(
            flops=N * C * S_pad, transcendentals=0,
            bytes_accessed=2 * N * C * S_pad * itemsize),
    )(x_flat, g)

    return out_flat[:, :, :s_true]


# --------------------------------------------------------------------------
# Public entry point
# --------------------------------------------------------------------------
def ca_layer(x, w1, b1, w2, b2, *, donate_x=False, force_split_s=False):
    """CALayer forward.

    x : (N, C, D, H, W) (NCDHW, PyTorch convention).
    w1: (C//r, C), b1: (C//r,)  -- first 1x1x1 Conv3d weight/bias, squeezed.
    w2: (C, C//r), b2: (C,)     -- second 1x1x1 Conv3d weight/bias, squeezed.
    donate_x: set True ONLY if the caller actually donates x's buffer;
      otherwise XLA inserts a defensive HBM copy of x (doubling HBM traffic).
    """
    N, C, D, H, W = x.shape
    S = D * H * W
    Cr = w1.shape[0]
    itemsize = jnp.dtype(x.dtype).itemsize

    # Generation-aware VMEM budgeting (64 MiB v7x, 128 MiB v5e/v6e).
    vmem_cap = _vmem_capacity_bytes()
    usable = (vmem_cap * 3) // 4                      # ~25% headroom
    weight_bytes = sum(int(a.size) * jnp.dtype(a.dtype).itemsize
                       for a in (w1, b1, w2, b2))
    # 2x double-buffered input blocks + 2x output blocks + resident weights.
    target_block_bytes = max(
        1 << 20, min(16 << 20, (usable - 2 * weight_bytes - (2 << 20)) // 4))

    # Pad S to a multiple of 128 so stores stay unmasked lane-dense vst and
    # the pooling reduce is unmasked (zero padding leaves the sums unchanged;
    # we still divide by the true S).
    S_pad = pl.cdiv(S, 128) * 128
    x_flat = x.reshape(N, C, S)
    if S_pad != S:
        x_flat = jnp.pad(x_flat, ((0, 0), (0, 0), (0, S_pad - S)))

    per_batch_bytes = C * S_pad * itemsize
    if force_split_s or per_batch_bytes > target_block_bytes:
        # A single batch row already blows the 4x-buffered VMEM budget
        # (earliest on v7x's 64 MiB): two-pass split-S scheme.
        out_flat = _ca_layer_split_s(x_flat, w1, b1, w2, b2, S, vmem_cap,
                                     target_block_bytes, itemsize)
    else:
        nb = _choose_batch_block(N, per_batch_bytes, target_block_bytes)
        block_bytes = nb * per_batch_bytes
        vmem_limit = int(min(
            vmem_cap,
            max(32 << 20, 4 * block_bytes + 2 * weight_bytes + (4 << 20))))

        b1_2d = b1.reshape(1, Cr)   # row vectors: no in-kernel transpose
        b2_2d = b2.reshape(1, C)
        kernel = functools.partial(_ca_fused_kernel, inv_s=1.0 / float(S))

        out_flat = pl.pallas_call(
            kernel,
            out_shape=jax.ShapeDtypeStruct((N, C, S_pad), x.dtype),
            grid_spec=pltpu.PrefetchScalarGridSpec(
                num_scalar_prefetch=0,
                grid=(pl.cdiv(N, nb),),               # ragged N handled by Pallas
                in_specs=[
                    pl.BlockSpec((nb, C, S_pad), lambda n: (n, 0, 0)),   # x blocks
                    pl.BlockSpec((Cr, C), lambda n: (0, 0)),             # w1 (resident)
                    pl.BlockSpec((1, Cr), lambda n: (0, 0)),             # b1
                    pl.BlockSpec((C, Cr), lambda n: (0, 0)),             # w2
                    pl.BlockSpec((1, C), lambda n: (0, 0)),              # b2
                ],
                out_specs=pl.BlockSpec((nb, C, S_pad), lambda n: (n, 0, 0)),
            ),
            # Alias only when the caller really donates x; otherwise XLA would
            # insert a defensive copy, doubling HBM traffic of this streaming
            # (memory-bound) kernel.
            input_output_aliases={0: 0} if donate_x else {},
            compiler_params=pltpu.CompilerParams(
                dimension_semantics=("parallel",),
                vmem_limit_bytes=vmem_limit),
            cost_estimate=pl.CostEstimate(
                flops=3 * N * C * S_pad,
                transcendentals=N * (C + Cr),
                bytes_accessed=2 * N * C * S_pad * itemsize + weight_bytes),
        )(x_flat, w1, b1_2d, w2, b2_2d)

        if S_pad != S:
            out_flat = out_flat[:, :, :S]

    return out_flat.reshape(N, C, D, H, W)


def _reference(x, w1, b1, w2, b2):
    # Pure-JAX reference mirroring the PyTorch forward.
    pooled = jnp.mean(x, axis=(2, 3, 4))                       # (N, C)
    h = jnp.maximum(pooled @ w1.T + b1, 0.0)                   # (N, Cr)
    g = jax.nn.sigmoid(h @ w2.T + b2)                          # (N, C)
    return x * g[:, :, None, None, None]


if __name__ == "__main__":
    key = jax.random.PRNGKey(0)
    k_x, k_w1, k_b1, k_w2, k_b2 = jax.random.split(key, 5)

    # channel=32, reduction=16 -> hidden=2 ; spatial D,H,W = 4,8,16 (S=512)
    N, C, reduction = 2, 32, 16
    Cr = C // reduction
    D, H, W = 4, 8, 16

    x = jax.random.normal(k_x, (N, C, D, H, W), dtype=jnp.float32)
    # Deterministic synthetic parameters (Conv3d 1x1x1 kernels, squeezed).
    w1 = 0.2 * jax.random.normal(k_w1, (Cr, C), dtype=jnp.float32)
    b1 = 0.1 * jax.random.normal(k_b1, (Cr,), dtype=jnp.float32)
    w2 = 0.2 * jax.random.normal(k_w2, (C, Cr), dtype=jnp.float32)
    b2 = 0.1 * jax.random.normal(k_b2, (C,), dtype=jnp.float32)

    ref = jax.block_until_ready(_reference(x, w1, b1, w2, b2))

    # Fused single-pass path (no aliasing by default: x is reused below).
    out = jax.block_until_ready(ca_layer(x, w1, b1, w2, b2))
    assert out.shape == x.shape
    assert jnp.allclose(out, ref, atol=1e-5, rtol=1e-5)

    # Also exercise the split-S fallback (used when a single batch row would
    # not fit the VMEM budget, e.g. very large D*H*W on v7x's 64 MiB).
    out_split = jax.block_until_ready(
        ca_layer(x, w1, b1, w2, b2, force_split_s=True))
    assert jnp.allclose(out_split, ref, atol=1e-5, rtol=1e-5)

    print("KERNEL_OK")
</pallas_src>

<mosaic_0001>
module attributes {stable_mosaic.version = 11 : i64} {
  func.func @_ca_fused_kernel(%arg0: i32, %arg1: memref<1x32x512xf32, #tpu.memory_space<vmem>>, %arg2: memref<2x32xf32, #tpu.memory_space<vmem>>, %arg3: memref<1x2xf32, #tpu.memory_space<vmem>>, %arg4: memref<32x2xf32, #tpu.memory_space<vmem>>, %arg5: memref<1x32xf32, #tpu.memory_space<vmem>>, %arg6: memref<1x32x512xf32, #tpu.memory_space<vmem>>) attributes {dimension_semantics = [#tpu.dimension_semantics<parallel>], iteration_bounds = array<i64: 2>, scalar_prefetch = 0 : i64, scratch_operands = 0 : i64, tpu.core_type = #tpu.core_type<tc>, window_params = [{transform_indices = @transform_0, window_bounds = array<i64: 1, 32, 512>}, {pipeline_mode = #tpu.pipeline_mode<synchronous>, transform_indices = @transform_1, window_bounds = array<i64: 2, 32>}, {pipeline_mode = #tpu.pipeline_mode<synchronous>, transform_indices = @transform_2, window_bounds = array<i64: 1, 2>}, {pipeline_mode = #tpu.pipeline_mode<synchronous>, transform_indices = @transform_3, window_bounds = array<i64: 32, 2>}, {pipeline_mode = #tpu.pipeline_mode<synchronous>, transform_indices = @transform_4, window_bounds = array<i64: 1, 32>}, {transform_indices = @transform_5, window_bounds = array<i64: 1, 32, 512>}]} {
    %c0 = arith.constant 0 : index
    %c0_0 = arith.constant 0 : index
    %c0_1 = arith.constant 0 : index
    %0 = vector.load %arg1[%c0, %c0_0, %c0_1] : memref<1x32x512xf32, #tpu.memory_space<vmem>>, vector<1x32x512xf32>
    %cst = arith.constant dense<0.000000e+00> : vector<1x32xf32>
    %1 = vector.multi_reduction <add>, %0, %cst [2] : vector<1x32x512xf32> to vector<1x32xf32>
    %cst_2 = arith.constant 0.001953125 : f32
    %2 = vector.broadcast %cst_2 : f32 to vector<1x32xf32>
    %3 = arith.mulf %1, %2 : vector<1x32xf32>
    %c0_3 = arith.constant 0 : index
    %c0_4 = arith.constant 0 : index
    %4 = vector.load %arg2[%c0_3, %c0_4] : memref<2x32xf32, #tpu.memory_space<vmem>>, vector<2x32xf32>
    %5 = vector.shape_cast %3 : vector<1x32xf32> to vector<1x1x32xf32>
    %6 = vector.shape_cast %4 : vector<2x32xf32> to vector<1x2x32xf32>
    %7 = vector.broadcast %5 : vector<1x1x32xf32> to vector<1x2x32xf32>
    %8 = arith.mulf %7, %6 : vector<1x2x32xf32>
    %cst_5 = arith.constant dense<0.000000e+00> : vector<1x2xf32>
    %9 = vector.multi_reduction <add>, %8, %cst_5 [2] : vector<1x2x32xf32> to vector<1x2xf32>
    %c0_6 = arith.constant 0 : index
    %c0_7 = arith.constant 0 : index
    %10 = vector.load %arg3[%c0_6, %c0_7] : memref<1x2xf32, #tpu.memory_space<vmem>>, vector<1x2xf32>
    %11 = arith.addf %9, %10 : vector<1x2xf32>
    %cst_8 = arith.constant 0.000000e+00 : f32
    %12 = vector.broadcast %cst_8 : f32 to vector<1x2xf32>
    %13 = arith.maximumf %11, %12 : vector<1x2xf32>
    %c0_9 = arith.constant 0 : index
    %c0_10 = arith.constant 0 : index
    %14 = vector.load %arg4[%c0_9, %c0_10] : memref<32x2xf32, #tpu.memory_space<vmem>>, vector<32x2xf32>
    %15 = vector.shape_cast %13 : vector<1x2xf32> to vector<1x1x2xf32>
    %16 = vector.shape_cast %14 : vector<32x2xf32> to vector<1x32x2xf32>
    %17 = vector.broadcast %15 : vector<1x1x2xf32> to vector<1x32x2xf32>
    %18 = arith.mulf %17, %16 : vector<1x32x2xf32>
    %cst_11 = arith.constant dense<0.000000e+00> : vector<1x32xf32>
    %19 = vector.multi_reduction <add>, %18, %cst_11 [2] : vector<1x32x2xf32> to vector<1x32xf32>
    %c0_12 = arith.constant 0 : index
    %c0_13 = arith.constant 0 : index
    %20 = vector.load %arg5[%c0_12, %c0_13] : memref<1x32xf32, #tpu.memory_space<vmem>>, vector<1x32xf32>
    %21 = arith.addf %19, %20 : vector<1x32xf32>
    %22 = arith.negf %21 : vector<1x32xf32>
    %23 = math.exp %22 : vector<1x32xf32>
    %cst_14 = arith.constant 1.000000e+00 : f32
    %24 = vector.broadcast %cst_14 : f32 to vector<1x32xf32>
    %25 = arith.addf %24, %23 : vector<1x32xf32>
    %26 = arith.divf %24, %25 : vector<1x32xf32>
    %c0_15 = arith.constant 0 : index
    %c0_16 = arith.constant 0 : index
    %c0_17 = arith.constant 0 : index
    %27 = vector.load %arg1[%c0_15, %c0_16, %c0_17] : memref<1x32x512xf32, #tpu.memory_space<vmem>>, vector<1x32x512xf32>
    %28 = vector.shape_cast %26 : vector<1x32xf32> to vector<1x32x1xf32>
    %29 = vector.broadcast %28 : vector<1x32x1xf32> to vector<1x32x512xf32>
    %30 = arith.mulf %27, %29 : vector<1x32x512xf32>
    %c0_18 = arith.constant 0 : index
    %c0_19 = arith.constant 0 : index
    %c0_20 = arith.constant 0 : index
    %31 = vector.load %arg6[%c0_18, %c0_19, %c0_20] : memref<1x32x512xf32, #tpu.memory_space<vmem>>, vector<1x32x512xf32>
    tpu.vector_store %arg6[%c0_18, %c0_19, %c0_20], %30 {strides = array<i32>} : memref<1x32x512xf32, #tpu.memory_space<vmem>>, vector<1x32x512xf32>,
    return
  }
  func.func @transform_0(%arg0: i32) -> (i32, i32, i32) {
    %c0_i32 = arith.constant 0 : i32
    %c0_i32_0 = arith.constant 0 : i32
    %c0_i32_1 = arith.constant 0 : i32
    return %arg0, %c0_i32, %c0_i32_0 : i32, i32, i32
  }
  func.func @transform_1(%arg0: i32) -> (i32, i32) {
    %c0_i32 = arith.constant 0 : i32
    %c0_i32_0 = arith.constant 0 : i32
    %c0_i32_1 = arith.constant 0 : i32
    return %c0_i32, %c0_i32_0 : i32, i32
  }
  func.func @transform_2(%arg0: i32) -> (i32, i32) {
    %c0_i32 = arith.constant 0 : i32
    %c0_i32_0 = arith.constant 0 : i32
    %c0_i32_1 = arith.constant 0 : i32
    return %c0_i32, %c0_i32_0 : i32, i32
  }
  func.func @transform_3(%arg0: i32) -> (i32, i32) {
    %c0_i32 = arith.constant 0 : i32
    %c0_i32_0 = arith.constant 0 : i32
    %c0_i32_1 = arith.constant 0 : i32
    return %c0_i32, %c0_i32_0 : i32, i32
  }
  func.func @transform_4(%arg0: i32) -> (i32, i32) {
    %c0_i32 = arith.constant 0 : i32
    %c0_i32_0 = arith.constant 0 : i32
    %c0_i32_1 = arith.constant 0 : i32
    return %c0_i32, %c0_i32_0 : i32, i32
  }
  func.func @transform_5(%arg0: i32) -> (i32, i32, i32) {
    %c0_i32 = arith.constant 0 : i32
    %c0_i32_0 = arith.constant 0 : i32
    %c0_i32_1 = arith.constant 0 : i32
    return %arg0, %c0_i32, %c0_i32_0 : i32, i32, i32
  }
}

</mosaic_0001>

<bundles_post_ra>
// kernel: tpu_custom_call.1
= control target key start
LH: loop header
LB: loop body
LE: loop exit
PB: predicated region body
PF: predicated region fallthrough
CT: control target
= control target key end

     0   :  { %10 = vsyncpa [#allocation3], 0  ;;  %s1883_s0 = inlined_call_operand.hbm [shape: f32[2,32,512], index: 0, kind: input, shape index: {}]   ;;  %s1884_s1 = inlined_call_operand.vmem [shape: f32[2,32], index: 1, kind: input, shape index: {}]   ;;  %s1885_s2 = inlined_call_operand.vmem [shape: f32[1,2], index: 2, kind: input, shape index: {}]   ;;  %s1886_s3 = inlined_call_operand.vmem [shape: f32[32,2], index: 3, kind: input, shape index: {}]   ;;  %s1887_s4 = inlined_call_operand.vmem [shape: f32[1,32], index: 4, kind: input, shape index: {}]   ;;  %s1888_s5 = inlined_call_operand.hbm [shape: f32[2,32,512], index: 5, kind: output, shape index: {}]  }
   0x1   :  { %12 = vsyncpa [#allocation3 + $0x1], 0 }
   0x2   :  { %13 = vsyncpa [#allocation4], 0 }
   0x3   :  { %15 = vsyncpa [#allocation4 + $0x1], 0  ;;  %s1457_s18 = smov 0   ;;  %s1459_s19 = smov 0  }
   0x4   :  { %s1461_s20 = smov 0   ;;  %s1463_s21 = smov 0  }
   0x5 LB: > { %s1478_s22 = sadd.s32 4294967295, %s1418_s21   ;;  %s1231_s23 = sadd.s32 4294967294, %s1418_s21   ;;  %s1418_s21 = sphi %s1463_s21, %s1901_s21   ;;  %s1414_s20 = sphi %s1461_s20, %s1900_s20   ;;  %s1410_s19 = sphi %s1459_s19, %s1899_s19   ;;  %s1406_s18 = sphi %s1457_s18, %s1898_s18  }
   0x6   : > { %s1482_s24 = sadd.s32 1, %s1418_s21   ;;  %s28_s25 = sadd.s32 1, %s1414_s20 }
   0x7   : > { %s25_s26 = ssub.s32 %s1418_s21, %s1482_s24  ;;  %p35_p0 = scmp.ne.s32.totalorder %s1414_s20, %s1410_s19 }
   0x8   : > { %p26_p1 = scmp.eq.s32.totalorder %s25_s26, 0  ;;  %p36_p2 = scmp.eq.s32.totalorder %s1418_s21, 0 }
   0x9   : > { %p41_p3 = scmp.ne.s32.totalorder %s1410_s19, %s1406_s18  ;;  %p42_p4 = scmp.eq.s32.totalorder %s1478_s22, 0 }
   0xa   : > { %s1494_s27 = scalar_select %p26_p1, %s1414_s20, %s28_s25  }
   0xb   : > { %p1496_p5 = por %p36_p2, %p35_p0  ;;  %p1500_p6 = por %p42_p4, %p41_p3 }
   0xc   : > { %p149_p7 = scmp.eq.s32.totalorder %s1478_s22, 1  ;;  %p155_p8 = scmp.eq.s32.totalorder %s1231_s23, 1 }
   0xd   : > { %p1265_p10 = scmp.lt.s32.totalorder %s1418_s21, 2  ;;  %s187_s7 = sand.u32 1, %s1414_s20  }
   0xe   : > { %p1507_p11 = por %p149_p7, %p35_p0  ;;  %p1511_p12 = por %p155_p8, %p41_p3 }
   0xf   : > { %s1251_s8 = sshll.u32 %s1418_s21, 11  ;;  %s1234_s9 = sshll.u32 %s187_s7, 7 }
  0x10   : > { %s1892_s30 = scalar_select %p1507_p11, 1, 0 }
  0x11   : > { %s1893_s6 = scalar_select %p1511_p12, 1, 0 }
  0x12   : > { %s1520_s12 = scalar_lea.hbm %s1883_s0, %s1251_s8  ;;  %s191_s13 = scalar_lea.vmem [#allocation2], %s1234_s9 }
  0x13   : > { %s198_s14 = sshll.u32 %s191_s13, 4  ;;  %p1524_p13 = pnand %p1265_p10, %p1496_p5  ;;  %s1528_s14 = int_to_ptr.vmem [resolvable:$true] %s198_s14 }
  0x14   : > { %s1530_s16 = scalar_lea.sflag [#allocation3], %s187_s7  ;;  %s1322_s17 = scalar_lea.hbm %s1520_s12, 2048 }
  0x15   : > { %p1323_p0 = scmp.ne.s32.totalorder %s1520_s12, %s1322_s17  ;;  %p1324_p1 = pneg %p1524_p13 }
  0x16   : > { %s1327_s26 = scalar_lea.hbm %s1883_s0, 4096  ;;  %p1328_p4 = scmp.lt.u32.totalorder %s1520_s12, %s1883_s0 }
  0x17   : > { %p1325_p2 = pnand %p1324_p1, %p1323_p0  ;;  %p1329_p5 = scmp.lt.u32.totalorder %s1327_s26, %s1322_s17 }
  0x18   : > { %p1331_p8 = scmp.lt.u32.totalorder %s1322_s17, %s1520_s12 }
  0x19   : > { %p1326_p3 = pneg %p1325_p2  ;;  %p1330_p7 = por %p1329_p5, %p1328_p4 }
  0x1b   : > { %p1332_p10 = por %p1331_p8, %p1330_p7 }
  0x1d   : > { %p1333_p9 = pnand %p1332_p10, %p1326_p3 }
  0x1f   : > { %1336 = shalt.err (!%p1333_p9)
}
  0x20   : > { %s1337_s7 = scalar_lea.vmem %s1528_s14, 2048  ;;  %s1420_s9 = smov [#allocation2]  }
  0x21   : > { %p1338_p0 = scmp.ne.s32.totalorder %s1528_s14, %s1337_s7  ;;  %s1342_s10 = sshll.u32 %s1420_s9, 4  ;;  %s1343_s10 = int_to_ptr.vmem [resolvable:$false] %s1342_s10 }
  0x22   : > { %s1344_s11 = scalar_lea.vmem %s1343_s10, 4096  ;;  %p1345_p11 = scmp.lt.s32.totalorder %s1528_s14, %s1343_s10 }
  0x23   : > { %p1340_p2 = pnand %p1338_p0, %p1324_p1  ;;  %p1346_p4 = scmp.lt.s32.totalorder %s1344_s11, %s1337_s7 }
  0x25   : > { %p1341_p12 = pneg %p1340_p2  ;;  %p1347_p5 = por %p1346_p4, %p1345_p11 }
  0x27   : > { %p1348_p7 = pnand %p1347_p5, %p1341_p12 }
  0x29   : > { %1351 = shalt.err (!%p1348_p7)
}
  0x2a   : > { %s1421_s13 = smov 512   ;;  %s1422_s17 = smov 32  }
  0x2b   : > { %1260 = dma.hbm_to_vmem [thread:$0]  (!%p1524_p13), %s1520_s12, 2048, %s1528_s14, %s1530_s16, %s1421_s13, %s1421_s13, %s1422_s17  }
  0x2c   : > { %p1237_p9 = scmp.ge.s32.totalorder %s1418_s21, 1  ;;  %p206_p1 = scmp.lt.s32.totalorder %s1418_s21, 3 }
  0x2e   : > { %p207_p3 = pnand %p1237_p9, %p206_p1 }
  0x2f   : > { %s1561_s23 = sand.u32 (!%p207_p3), 1, %s1410_s19  }
  0x30   : > { %210 = sbr.rel (%p207_p3) target bundleno = 1026 (0x402), region = 40  ;;  %s1238_s25 = sshll.u32 (!%p207_p3), %s1561_s23, 7 }
  0x31   : > { %s213_s26 = scalar_lea.sflag (!%p207_p3), [#allocation3], %s1561_s23  ;;  %s216_s28 = scalar_lea.vmem (!%p207_p3), [#allocation2], %s1238_s25 }
  0x37   : > { %1397 = dma.done.wait (%p1500_p6), %s213_s26, 2048  }
  0x38   : > { %1399 = vsyncadd (%p1500_p6), %s213_s26, 4294965248  ;;  %v1571_v0 = vld [vmem:[%s216_s28 + $0x40] sm:$0xff]  ;;  %v1573_v1 = vld [vmem:[%s216_s28 + $0x48] sm:$0xff]  ;;  %v285_v28 = vlaneseq  ;;  %v1423_v35 = vmov 0   ;;  %vm382_vm0 = vcmask 130112   ;;  %vm389_vm1 = vcmask 195712  }
  0x39   : > { %v1575_v2 = vld [vmem:[%s216_s28 + $0x50] sm:$0xff]  ;;  %v269_v3 = vadd.f32 %v1573_v1, %v1571_v0  ;;  %v1579_v4 = vld [vmem:[%s216_s28] sm:$0xff]  ;;  %v1581_v5 = vld [vmem:[%s216_s28 + $0x8] sm:$0xff]  ;;  %1305 = vset.pattern.permute.xlu1 %v1423_v35  ;;  %1304 = vset.pattern.permute.xlu0 %v1423_v35  ;;  %vm396_vm2 = vcmask 261312   ;;  %vm417_vm3 = vcmask 1041409   ;;  %vm420_vm4 = vcmask 254976  }
  0x3a   : > { %v1583_v6 = vld [vmem:[%s216_s28 + $0x58] sm:$0xff]  ;;  %v1585_v7 = vld [vmem:[%s216_s28 + $0x10] sm:$0xff]  ;;  %v259_v8 = vadd.f32 %v1581_v5, %v1579_v4  ;;  %v1589_v9 = vld [vmem:[%s216_s28 + $0x60] sm:$0xff]  ;;  %v1620_v29 = vshrl.u32 %v285_v28, 7  ;;  %vm989_vm5 = vcmask 1042434   ;;  %vm991_vm6 = vcmask 1043459  }
  0x3b   : > { %v270_v10 = vadd.f32 %v269_v3, %v1575_v2  ;;  %v1592_v11 = vld [vmem:[%s216_s28 + $0x18] sm:$0xff]  ;;  %v1594_v12 = vld [vmem:[%s216_s28 + $0x68] sm:$0xff]  ;;  %v1596_v13 = vld [vmem:[%s216_s28 + $0x70] sm:$0xff]  ;;  %vm993_vm7 = vcmask 1044484   ;;  %vm995_vm8 = vcmask 1045509   ;;  %vm997_vm9 = vcmask 1046534  }
  0x3c   : > { %v260_v14 = vadd.f32 %v259_v8, %v1585_v7  ;;  %v274_v15 = vadd.f32 %v1594_v12, %v1589_v9  ;;  %v1601_v16 = vld [vmem:[%s216_s28 + $0x20] sm:$0xff]  ;;  %v1603_v17 = vld [vmem:[%s216_s28 + $0x28] sm:$0xff]  ;;  %v1605_v18 = vld [vmem:[%s216_s28 + $0x30] sm:$0xff]  ;;  %v1623_v30 = vsub.s32 0, %v1620_v29  ;;  %v1630_v33 = vsub.s32 1, %v1620_v29  ;;  %s242_s29 = scalar_lea.vmem [#allocation5], %s1238_s25 }
  0x3d   : > { %v271_v19 = vadd.f32 %v270_v10, %v1583_v6  ;;  %v1608_v20 = vld [vmem:[%s216_s28 + $0x78] sm:$0xff]  ;;  %v264_v21 = vadd.f32 %v1603_v17, %v1601_v16  ;;  %v283_v31 = vld [vmem:[%s1884_s1] sm:$0x3]  ;;  %v460_v55 = vsub.s32 2, %v1620_v29  ;;  %v467_v61 = vsub.s32 3, %v1620_v29  ;;  %v438_v63 = vld [vmem:[%s1886_s3 + $0x10] sm:$0xff] }
  0x3e   : > { %v261_v22 = vadd.f32 %v260_v14, %v1592_v11  ;;  %v275_v23 = vadd.f32 %v274_v15, %v1596_v13  ;;  %v1614_v24 = vld [vmem:[%s216_s28 + $0x38] sm:$0xff]  ;;  %v288_v32 = vrot.slane %v283_v31, %v1623_v30  ;;  %v307_v34 = vrot.slane %v283_v31, %v1630_v33  ;;  %v436_v57 = vld [vmem:[%s1886_s3] sm:$0xff]  ;;  %s1252_s12 = sshll.u32 %s1478_s22, 11  ;;  %s1158_s14 = sshll.u32 %s242_s29, 4  ;;  %s1835_s14 = int_to_ptr.vmem [resolvable:$true] %s1158_s14 }
  0x3f   : > { %272 = vadd.xlane.f32.xlu1 %v271_v19  ;;  %v265_v25 = vadd.f32 %v264_v21, %v1605_v18  ;;  %v461_v60 = vrot.slane %v436_v57, %v460_v55  ;;  %v580_v8 = vrot.slane %v438_v63, %v467_v61  ;;  %v474_v10 = vsub.s32 4, %v1620_v29  ;;  %v1240_v14 = vld [vmem:[%s1885_s2] ss:$0 sm:$0xff]  ;;  %s1833_s16 = scalar_lea.hbm %s1888_s5, %s1252_s12  ;;  %s1145_s22 = scalar_lea.sflag [#allocation4], %s1561_s23 }
  0x40   : > { %262 = vadd.xlane.f32.xlu0 %v261_v22  ;;  %v276_v26 = vadd.f32 %v275_v23, %v1608_v20  ;;  %v447_v19 = vrot.slane %v436_v57, %v1623_v30  ;;  %v481_v22 = vsub.s32 5, %v1620_v29  ;;  %v454_v23 = vrot.slane %v436_v57, %v1630_v33  ;;  %s1352_s8 = scalar_lea.vmem %s1835_s14, 2048  ;;  %p1895_p11 = scmp.ne.s32.totalorder %s1892_s30, 0 }
  0x41   : > { %v266_v27 = vadd.f32 %v265_v25, %v1614_v24  ;;  %v475_v15 = vrot.slane %v436_v57, %v474_v10  ;;  %v587_v21 = vrot.slane %v438_v63, %v474_v10  ;;  %v437_v25 = vld [vmem:[%s1886_s3 + $0x8] sm:$0xff]  ;;  %vm999_vm10 = vcmask 1047559   ;;  %p1353_p6 = scmp.ne.s32.totalorder %s1835_s14, %s1352_s8  ;;  %s1424_s7 = smov [#allocation5]  }
  0x42   : > { %v594_v31 = vrot.slane %v438_v63, %v481_v22  ;;  %vm1026_vm11 = vcmask 15360   ;;  %s1356_s9 = sshll.u32 %s1424_s7, 4  ;;  %s1357_s9 = int_to_ptr.vmem [resolvable:$false] %s1356_s9 }
  0x43   : > { %277 = vadd.xlane.f32.xlu1 %v276_v26  ;;  %v482_v26 = vrot.slane %v436_v57, %v481_v22  ;;  %p1354_p12 = pnand %p1353_p6, %p1895_p11  ;;  %s1358_s10 = scalar_lea.vmem %s1357_s9, 4096 }
  0x44   : > { %267 = vadd.xlane.f32.xlu0 %v266_v27  ;;  %v503_v27 = vrot.slane %v437_v25, %v1623_v30  ;;  %p1359_p8 = scmp.lt.s32.totalorder %s1835_s14, %s1357_s9  ;;  %p1360_p10 = scmp.lt.s32.totalorder %s1358_s10, %s1352_s8 }
  0x45   : > { %p1355_p13 = pneg %p1354_p12 }
  0x46   : > { %p1361_p0 = por %p1360_p10, %p1359_p8 }
  0x48   : > { %p1362_p2 = pnand %p1361_p0, %p1355_p13 }
  0x54   : > { %294 = vbcast.lane.b32.xlu1 %v288_v32, 264 }
  0x58   : > { %309 = vbcast.lane.b32.xlu1 %v307_v34, 256 }
  0x5a   : > { %290 = vbcast.lane.b32.xlu0 %v288_v32, 256 }
  0x5c   : > { %313 = vbcast.lane.b32.xlu1 %v307_v34, 264 }
  0x5e   : > { %298 = vbcast.lane.b32.xlu0 %v288_v32, 272 }
  0x60   : > { %317 = vbcast.lane.b32.xlu1 %v307_v34, 272 }
  0x62   : > { %302 = vbcast.lane.b32.xlu0 %v288_v32, 280  ;;  %v488_v32 = vsub.s32 6, %v1620_v29 }
  0x64   : > { %321 = vbcast.lane.b32.xlu1 %v307_v34, 280  ;;  %v510_v34 = vrot.slane %v437_v25, %v1630_v33  ;;  %v489_v35 = vrot.slane %v436_v57, %v488_v32 }
  0xcc   : > { %v273_v36 = vpop.xlane.xlu1 %272 }
  0xcd   : > { %v263_v37 = vpop.xlane.xlu0 %262  ;;  %v281_v49 = vmul.f32 0.001953125, %v273_v36  ;;  %v559_v36 = vrot.slane %v438_v63, %v1623_v30 }
  0xce   : > { %v279_v41 = vmul.f32 0.001953125, %v263_v37  ;;  %v601_v37 = vrot.slane %v438_v63, %v488_v32 }
  0xd0   : > { %v278_v38 = vpop.xlane.xlu1 %277 }
  0xd1   : > { %v268_v39 = vpop.xlane.xlu0 %267  ;;  %v282_v54 = vmul.f32 0.001953125, %v278_v38  ;;  %v495_v38 = vsub.s32 7, %v1620_v29 }
  0xd2   : > { %v280_v40 = vmul.f32 0.001953125, %v268_v39  ;;  %v566_v39 = vrot.slane %v438_v63, %v1630_v33 }
  0xd4   : > { %v295_v42 = vpop.permute.xlu1 %294 }
  0xd5   : > { %v332_v43 = vmul.f32 %v295_v42, %v280_v40  ;;  %v291_v44 = vpop.permute.xlu0 %290 }
  0xd6   : > { %v331_v45 = vmul.f32 %v291_v44, %v279_v41 }
  0xd7   : > { %351 = vperm.xlu1 %1305, %v332_v43   ;;  %v608_v43 = vrot.slane %v438_v63, %v495_v38 }
  0xd8   : > { %348 = vperm.xlu0 %1304, %v331_v45   ;;  %v310_v46 = vpop.permute.xlu1 %309  ;;  %v517_v45 = vrot.slane %v437_v25, %v460_v55 }
  0xd9   : > { %v335_v47 = vmul.f32 %v310_v46, %v279_v41  ;;  %v299_v48 = vpop.permute.xlu0 %298  ;;  %v496_v41 = vrot.slane %v436_v57, %v495_v38  ;;  %v573_v46 = vrot.slane %v438_v63, %v460_v55 }
  0xda   : > { %v333_v51 = vmul.f32 %v299_v48, %v281_v49  ;;  %v468_v48 = vrot.slane %v436_v57, %v467_v61 }
  0xdb   : > { %360 = vperm.xlu1 %1305, %v335_v47  }
  0xdc   : > { %v314_v50 = vpop.permute.xlu1 %313 }
  0xdd   : > { %v336_v52 = vmul.f32 %v314_v50, %v280_v40  ;;  %v303_v53 = vpop.permute.xlu0 %302  ;;  %v439_v40 = vld [vmem:[%s1886_s3 + $0x18] sm:$0xff] }
  0xde   : > { %v334_v58 = vmul.f32 %v303_v53, %v282_v54  ;;  %v615_v42 = vrot.slane %v439_v40, %v1623_v30  ;;  %v622_v44 = vrot.slane %v439_v40, %v1630_v33  ;;  %v629_v47 = vrot.slane %v439_v40, %v460_v55 }
  0xdf   : > { %363 = vperm.xlu0 %1304, %v336_v52   ;;  %354 = vperm.xlu1 %1305, %v333_v51   ;;  %v636_v50 = vrot.slane %v439_v40, %v467_v61  ;;  %v531_v30 = vrot.slane %v437_v25, %v474_v10  ;;  %v643_v51 = vrot.slane %v439_v40, %v474_v10 }
  0xe0   : > { %v318_v56 = vpop.permute.xlu1 %317  ;;  %v538_v52 = vrot.slane %v437_v25, %v481_v22  ;;  %v650_v33 = vrot.slane %v439_v40, %v481_v22  ;;  %v545_v53 = vrot.slane %v437_v25, %v488_v32  ;;  %v552_v55 = vrot.slane %v437_v25, %v495_v38 }
  0xe1   : > { %v337_v59 = vmul.f32 %v318_v56, %v281_v49  ;;  %v524_v49 = vrot.slane %v437_v25, %v467_v61  ;;  %v664_v56 = vrot.slane %v439_v40, %v495_v38 }
  0xe3   : > { %366 = vperm.xlu0 %1304, %v337_v59   ;;  %357 = vperm.xlu1 %1305, %v334_v58   ;;  %v372_v58 = vand.u32 127, %v285_v28 }
  0xe4   : > { %v322_v62 = vpop.permute.xlu1 %321 }
  0xe5   : > { %v338_v3 = vmul.f32 %v322_v62, %v282_v54  ;;  %v657_v54 = vrot.slane %v439_v40, %v488_v32  ;;  %v377_v61 = vadd.s32 4294967288, %v372_v58  ;;  %v384_v62 = vadd.s32 4294967280, %v372_v58 }
  0xe6   : > { %v391_v63 = vadd.s32 4294967272, %v372_v58  ;;  %v1664_v10 = vsub.s32 %v372_v58, %v1620_v29 }
  0xe7   : > { %369 = vperm.xlu0 %1304, %v338_v3   ;;  %463 = vbcast.lane.b32.xlu1 %v461_v60, 256 }
  0xeb   : > { %582 = vbcast.lane.b32.xlu1 %v580_v8, 256  ;;  %431 = vbcast.lane.b32.xlu0 %v1240_v14, 256  ;;  %v380_v14 = vsub.s32 %v377_v61, %v1620_v29 }
  0xef   : > { %477 = vbcast.lane.b32.xlu1 %v475_v15, 256  ;;  %449 = vbcast.lane.b32.xlu0 %v447_v19, 256  ;;  %v387_v15 = vsub.s32 %v384_v62, %v1620_v29  ;;  %v394_v19 = vsub.s32 %v391_v63, %v1620_v29 }
  0xf3   : > { %589 = vbcast.lane.b32.xlu1 %v587_v21, 256  ;;  %456 = vbcast.lane.b32.xlu0 %v454_v23, 256 }
  0xf7   : > { %484 = vbcast.lane.b32.xlu1 %v482_v26, 256  ;;  %505 = vbcast.lane.b32.xlu0 %v503_v27, 256 }
  0xfb   : > { %596 = vbcast.lane.b32.xlu1 %v594_v31, 256  ;;  %512 = vbcast.lane.b32.xlu0 %v510_v34, 256 }
  0xff   : > { %491 = vbcast.lane.b32.xlu1 %v489_v35, 256  ;;  %561 = vbcast.lane.b32.xlu0 %v559_v36, 256 }
 0x103   : > { %603 = vbcast.lane.b32.xlu1 %v601_v37, 256  ;;  %568 = vbcast.lane.b32.xlu0 %v566_v39, 256 }
 0x107   : > { %498 = vbcast.lane.b32.xlu1 %v496_v41, 256  ;;  %617 = vbcast.lane.b32.xlu0 %v615_v42, 256 }
 0x10b   : > { %610 = vbcast.lane.b32.xlu1 %v608_v43, 256  ;;  %624 = vbcast.lane.b32.xlu0 %v622_v44, 256 }
 0x10f   : > { %519 = vbcast.lane.b32.xlu0 %v517_v45, 256 }
 0x113   : > { %575 = vbcast.lane.b32.xlu0 %v573_v46, 256 }
 0x117   : > { %631 = vbcast.lane.b32.xlu0 %v629_v47, 256 }
 0x11b   : > { %470 = vbcast.lane.b32.xlu0 %v468_v48, 256 }
 0x11f   : > { %526 = vbcast.lane.b32.xlu0 %v524_v49, 256 }
 0x123   : > { %638 = vbcast.lane.b32.xlu0 %v636_v50, 256 }
 0x127   : > { %533 = vbcast.lane.b32.xlu0 %v531_v30, 256 }
 0x12b   : > { %645 = vbcast.lane.b32.xlu0 %v643_v51, 256 }
 0x12f   : > { %540 = vbcast.lane.b32.xlu0 %v538_v52, 256 }
 0x133   : > { %652 = vbcast.lane.b32.xlu0 %v650_v33, 256 }
 0x137   : > { %547 = vbcast.lane.b32.xlu0 %v545_v53, 256 }
 0x13b   : > { %659 = vbcast.lane.b32.xlu0 %v657_v54, 256 }
 0x13f   : > { %554 = vbcast.lane.b32.xlu0 %v552_v55, 256 }
 0x143   : > { %666 = vbcast.lane.b32.xlu0 %v664_v56, 256 }
 0x156   : > { %v352_v57 = vpop.permute.xlu1 %351 }
 0x157   : > { %v349_v59 = vpop.permute.xlu0 %348  ;;  %v381_v23 = vrot.slane %v352_v57, %v380_v14 }
 0x158   : > { %v376_v28 = vrot.slane %v349_v59, %v1664_v10 }
 0x15a   : > { %v361_v60 = vpop.permute.xlu1 %360  ;;  %v383_v35 = vsel %vm382_vm0, %v381_v23, %v376_v28 }
 0x15b   : > { %v401_v31 = vrot.slane %v361_v60, %v1664_v10 }
 0x15e   : > { %v355_v3 = vpop.permute.xlu1 %354  ;;  %v364_v8 = vpop.permute.xlu0 %363 }
 0x15f   : > { %v405_v25 = vrot.slane %v364_v8, %v380_v14  ;;  %v388_v26 = vrot.slane %v355_v3, %v387_v15 }
 0x161   : > { %v406_v36 = vsel %vm382_vm0, %v405_v25, %v401_v31  ;;  %v390_v29 = vsel %vm389_vm1, %v388_v26, %v383_v35 }
 0x162   : > { %v358_v21 = vpop.permute.xlu1 %357  ;;  %v367_v22 = vpop.permute.xlu0 %366 }
 0x163   : > { %v410_v27 = vrot.slane %v367_v22, %v387_v15  ;;  %v395_v32 = vrot.slane %v358_v21, %v394_v19 }
 0x165   : > { %v411_v38 = vsel %vm389_vm1, %v410_v27, %v406_v36  ;;  %v397_v39 = vsel %vm396_vm2, %v395_v32, %v390_v29 }
 0x166   : > { %v370_v34 = vpop.permute.xlu0 %369  ;;  %v464_v45 = vpop.permute.xlu1 %463 }
 0x167   : > { %v415_v37 = vrot.slane %v370_v34, %v394_v19 }
 0x169   : > { %v416_v40 = vsel %vm396_vm2, %v415_v37, %v411_v38 }
 0x16a   : > { %v418_v41 = vsel %vm417_vm3, %v416_v40, %v397_v39  ;;  %v432_v43 = vpop.permute.xlu0 %431  ;;  %v583_v47 = vpop.permute.xlu1 %582 }
 0x16b   : > { %v421_v42 = vsel %vm420_vm4, %v418_v41, 0.0 }
 0x16c   : > { %422 = vadd.xlane.f32.xlu1 %v421_v42 }
 0x16e   : > { %v450_v44 = vpop.permute.xlu0 %449  ;;  %v478_v49 = vpop.permute.xlu1 %477 }
 0x172   : > { %v457_v46 = vpop.permute.xlu0 %456  ;;  %v590_v30 = vpop.permute.xlu1 %589 }
 0x176   : > { %v506_v48 = vpop.permute.xlu0 %505  ;;  %v1672_v52 = vpop.permute.xlu1 %484 }
 0x17a   : > { %v513_v50 = vpop.permute.xlu0 %512  ;;  %v1674_v53 = vpop.permute.xlu1 %596 }
 0x17e   : > { %v562_v51 = vpop.permute.xlu0 %561  ;;  %v1676_v55 = vpop.permute.xlu1 %491 }
 0x182   : > { %v569_v33 = vpop.permute.xlu0 %568  ;;  %v1678_v57 = vpop.permute.xlu1 %603 }
 0x186   : > { %v618_v54 = vpop.permute.xlu0 %617  ;;  %v1680_v59 = vpop.permute.xlu1 %498 }
 0x18a   : > { %v625_v56 = vpop.permute.xlu0 %624  ;;  %v1682_v61 = vpop.permute.xlu1 %610 }
 0x18e   : > { %v520_v58 = vpop.permute.xlu0 %519 }
 0x192   : > { %v576_v60 = vpop.permute.xlu0 %575 }
 0x196   : > { %v632_v62 = vpop.permute.xlu0 %631 }
 0x19a   : > { %v471_v8 = vpop.permute.xlu0 %470 }
 0x19e   : > { %v527_v21 = vpop.permute.xlu0 %526 }
 0x1a2   : > { %v639_v26 = vpop.permute.xlu0 %638 }
 0x1a6   : > { %v534_v32 = vpop.permute.xlu0 %533 }
 0x1aa   : > { %v646_v29 = vpop.permute.xlu0 %645 }
 0x1ae   : > { %v541_v40 = vpop.permute.xlu0 %540 }
 0x1f9   : > { %v423_v63 = vpop.xlane.xlu1 %422 }
 0x1fa   : > { %v434_v3 = vadd.f32 %v432_v43, %v423_v63 }
 0x1fc   : > { %v1684_v14 = vmax.f32 %v434_v3, 0.0 }
 0x1fe   : > { %v700_v15 = vmul.f32 %v450_v44, %v1684_v14  ;;  %v701_v19 = vmul.f32 %v457_v46, %v1684_v14  ;;  %v708_v22 = vmul.f32 %v506_v48, %v1684_v14  ;;  %v709_v23 = vmul.f32 %v513_v50, %v1684_v14 }
 0x1ff   : > { %v716_v28 = vmul.f32 %v562_v51, %v1684_v14  ;;  %v717_v25 = vmul.f32 %v569_v33, %v1684_v14  ;;  %v724_v27 = vmul.f32 %v618_v54, %v1684_v14  ;;  %v725_v31 = vmul.f32 %v625_v56, %v1684_v14 }
 0x200   : > { %765 = vperm.xlu1 %1305, %v700_v15   ;;  %768 = vperm.xlu0 %1304, %v701_v19   ;;  %v702_v34 = vmul.f32 %v464_v45, %v1684_v14  ;;  %v710_v35 = vmul.f32 %v520_v58, %v1684_v14  ;;  %v718_v36 = vmul.f32 %v576_v60, %v1684_v14  ;;  %v653_v45 = vpop.permute.xlu0 %652 }
 0x201   : > { %v726_v37 = vmul.f32 %v632_v62, %v1684_v14  ;;  %v703_v38 = vmul.f32 %v471_v8, %v1684_v14  ;;  %v711_v39 = vmul.f32 %v527_v21, %v1684_v14  ;;  %v719_v41 = vmul.f32 %v583_v47, %v1684_v14 }
 0x202   : > { %v727_v42 = vmul.f32 %v639_v26, %v1684_v14  ;;  %v704_v43 = vmul.f32 %v478_v49, %v1684_v14  ;;  %v712_v44 = vmul.f32 %v534_v32, %v1684_v14  ;;  %v720_v46 = vmul.f32 %v590_v30, %v1684_v14 }
 0x203   : > { %v728_v48 = vmul.f32 %v646_v29, %v1684_v14  ;;  %v705_v47 = vmul.f32 %v1672_v52, %v1684_v14  ;;  %v713_v51 = vmul.f32 %v541_v40, %v1684_v14  ;;  %v721_v49 = vmul.f32 %v1674_v53, %v1684_v14 }
 0x204   : > { %789 = vperm.xlu1 %1305, %v708_v22   ;;  %792 = vperm.xlu0 %1304, %v709_v23   ;;  %v548_v50 = vpop.permute.xlu0 %547  ;;  %v729_v33 = vmul.f32 %v653_v45, %v1684_v14  ;;  %v706_v30 = vmul.f32 %v1676_v55, %v1684_v14  ;;  %v722_v52 = vmul.f32 %v1678_v57, %v1684_v14  ;;  %v1727_v57 = vld [vmem:[%s1887_s4] ss:$0 sm:$0xff] }
 0x205   : > { %v714_v56 = vmul.f32 %v548_v50, %v1684_v14  ;;  %v707_v53 = vmul.f32 %v1680_v59, %v1684_v14  ;;  %v723_v55 = vmul.f32 %v1682_v61, %v1684_v14 }
 0x208   : > { %813 = vperm.xlu1 %1305, %v716_v28   ;;  %816 = vperm.xlu0 %1304, %v717_v25   ;;  %v660_v54 = vpop.permute.xlu0 %659 }
 0x209   : > { %v730_v60 = vmul.f32 %v660_v54, %v1684_v14 }
 0x20c   : > { %837 = vperm.xlu1 %1305, %v724_v27   ;;  %840 = vperm.xlu0 %1304, %v725_v31   ;;  %v555_v58 = vpop.permute.xlu0 %554 }
 0x20d   : > { %v715_v62 = vmul.f32 %v555_v58, %v1684_v14 }
 0x210   : > { %771 = vperm.xlu1 %1305, %v702_v34   ;;  %795 = vperm.xlu0 %1304, %v710_v35   ;;  %v667_v63 = vpop.permute.xlu0 %666 }
 0x211   : > { %v731_v3 = vmul.f32 %v667_v63, %v1684_v14 }
 0x214   : > { %819 = vperm.xlu1 %1305, %v718_v36   ;;  %843 = vperm.xlu0 %1304, %v726_v37  }
 0x218   : > { %774 = vperm.xlu1 %1305, %v703_v38   ;;  %798 = vperm.xlu0 %1304, %v711_v39  }
 0x21c   : > { %822 = vperm.xlu1 %1305, %v719_v41   ;;  %846 = vperm.xlu0 %1304, %v727_v42  }
 0x220   : > { %777 = vperm.xlu1 %1305, %v704_v43   ;;  %801 = vperm.xlu0 %1304, %v712_v44  }
 0x224   : > { %825 = vperm.xlu1 %1305, %v720_v46   ;;  %849 = vperm.xlu0 %1304, %v728_v48  }
 0x228   : > { %780 = vperm.xlu1 %1305, %v705_v47   ;;  %804 = vperm.xlu0 %1304, %v713_v51  }
 0x22c   : > { %828 = vperm.xlu1 %1305, %v721_v49   ;;  %852 = vperm.xlu0 %1304, %v729_v33  }
 0x230   : > { %783 = vperm.xlu1 %1305, %v706_v30   ;;  %807 = vperm.xlu0 %1304, %v714_v56  }
 0x234   : > { %831 = vperm.xlu1 %1305, %v722_v52   ;;  %855 = vperm.xlu0 %1304, %v730_v60  }
 0x238   : > { %786 = vperm.xlu1 %1305, %v707_v53   ;;  %810 = vperm.xlu0 %1304, %v715_v62  }
 0x23c   : > { %834 = vperm.xlu1 %1305, %v723_v55   ;;  %858 = vperm.xlu0 %1304, %v731_v3  }
 0x240   : > { %1050 = vbcast.lane.b32.xlu1 %v1727_v57, 264  ;;  %1046 = vbcast.lane.b32.xlu0 %v1727_v57, 256 }
 0x27f   : > { %v766_v59 = vpop.permute.xlu1 %765  ;;  %v769_v8 = vpop.permute.xlu0 %768 }
 0x280   : > { %v863_v42 = vrot.slane %v766_v59, %v1664_v10  ;;  %v867_v43 = vrot.slane %v769_v8, %v1664_v10 }
 0x282   : > { %v988_v58 = vsel %vm417_vm3, %v867_v43, %v863_v42 }
 0x283   : > { %v790_v15 = vpop.permute.xlu1 %789  ;;  %v793_v19 = vpop.permute.xlu0 %792 }
 0x284   : > { %v895_v44 = vrot.slane %v790_v15, %v1664_v10  ;;  %v899_v45 = vrot.slane %v793_v19, %v1664_v10 }
 0x286   : > { %v1001_v60 = vsel %vm417_vm3, %v899_v45, %v895_v44 }
 0x287   : > { %v814_v21 = vpop.permute.xlu1 %813  ;;  %v817_v22 = vpop.permute.xlu0 %816 }
 0x288   : > { %v927_v46 = vrot.slane %v814_v21, %v1664_v10  ;;  %v931_v48 = vrot.slane %v817_v22, %v1664_v10 }
 0x28a   : > { %v1008_v62 = vsel %vm417_vm3, %v931_v48, %v927_v46 }
 0x28b   : > { %v838_v61 = vpop.permute.xlu1 %837  ;;  %v841_v23 = vpop.permute.xlu0 %840 }
 0x28c   : > { %v959_v50 = vrot.slane %v838_v61, %v1664_v10  ;;  %v963_v47 = vrot.slane %v841_v23, %v1664_v10 }
 0x28e   : > { %v1015_v63 = vsel %vm417_vm3, %v963_v47, %v959_v50 }
 0x28f   : > { %v772_v14 = vpop.permute.xlu1 %771  ;;  %v796_v28 = vpop.permute.xlu0 %795 }
 0x290   : > { %v871_v49 = vrot.slane %v772_v14, %v1664_v10  ;;  %v903_v33 = vrot.slane %v796_v28, %v1664_v10 }
 0x292   : > { %v990_v8 = vsel %vm989_vm5, %v871_v49, %v988_v58  ;;  %v1002_v15 = vsel %vm989_vm5, %v903_v33, %v1001_v60 }
 0x293   : > { %v820_v25 = vpop.permute.xlu1 %819  ;;  %v844_v26 = vpop.permute.xlu0 %843 }
 0x294   : > { %v935_v30 = vrot.slane %v820_v25, %v1664_v10  ;;  %v967_v56 = vrot.slane %v844_v26, %v1664_v10 }
 0x296   : > { %v1009_v61 = vsel %vm989_vm5, %v935_v30, %v1008_v62  ;;  %v1016_v23 = vsel %vm989_vm5, %v967_v56, %v1015_v63 }
 0x297   : > { %v775_v27 = vpop.permute.xlu1 %774  ;;  %v799_v31 = vpop.permute.xlu0 %798 }
 0x298   : > { %v875_v52 = vrot.slane %v775_v27, %v1664_v10  ;;  %v907_v53 = vrot.slane %v799_v31, %v1664_v10 }
 0x29a   : > { %v992_v14 = vsel %vm991_vm6, %v875_v52, %v990_v8  ;;  %v1003_v25 = vsel %vm991_vm6, %v907_v53, %v1002_v15 }
 0x29b   : > { %v1731_v32 = vpop.permute.xlu1 %822  ;;  %v1733_v34 = vpop.permute.xlu0 %846 }
 0x29c   : > { %v939_v26 = vrot.slane %v1731_v32, %v1664_v10  ;;  %v971_v27 = vrot.slane %v1733_v34, %v1664_v10 }
 0x29e   : > { %v1010_v50 = vsel %vm991_vm6, %v939_v26, %v1009_v61  ;;  %v1017_v49 = vsel %vm991_vm6, %v971_v27, %v1016_v23 }
 0x29f   : > { %v778_v35 = vpop.permute.xlu1 %777  ;;  %v802_v36 = vpop.permute.xlu0 %801 }
 0x2a0   : > { %v879_v55 = vrot.slane %v778_v35, %v1664_v10  ;;  %v911_v3 = vrot.slane %v802_v36, %v1664_v10 }
 0x2a2   : > { %v994_v35 = vsel %vm993_vm7, %v879_v55, %v992_v14  ;;  %v1004_v36 = vsel %vm993_vm7, %v911_v3, %v1003_v25 }
 0x2a3   : > { %v1735_v37 = vpop.permute.xlu1 %825  ;;  %v1737_v29 = vpop.permute.xlu0 %849 }
 0x2a7   : > { %v781_v38 = vpop.permute.xlu1 %780  ;;  %v805_v39 = vpop.permute.xlu0 %804 }
 0x2a8   : > { %v883_v19 = vrot.slane %v781_v38, %v1664_v10  ;;  %v915_v21 = vrot.slane %v805_v39, %v1664_v10  ;;  %v943_v38 = vrot.slane %v1735_v37, %v1664_v10  ;;  %v975_v39 = vrot.slane %v1737_v29, %v1664_v10 }
 0x2aa   : > { %v996_v43 = vsel %vm995_vm8, %v883_v19, %v994_v35  ;;  %v1005_v32 = vsel %vm995_vm8, %v915_v21, %v1004_v36  ;;  %v1011_v33 = vsel %vm993_vm7, %v943_v38, %v1010_v50  ;;  %v1018_v56 = vsel %vm993_vm7, %v975_v39, %v1017_v49 }
 0x2ab   : > { %v1739_v40 = vpop.permute.xlu1 %828  ;;  %v1741_v41 = vpop.permute.xlu0 %852 }
 0x2ac   : > { %v947_v34 = vrot.slane %v1739_v40, %v1664_v10  ;;  %v979_v46 = vrot.slane %v1741_v41, %v1664_v10 }
 0x2ae   : > { %v1012_v52 = vsel %vm995_vm8, %v947_v34, %v1011_v33  ;;  %v1019_v62 = vsel %vm995_vm8, %v979_v46, %v1018_v56 }
 0x2af   : > { %v784_v51 = vpop.permute.xlu1 %783  ;;  %v808_v54 = vpop.permute.xlu0 %807 }
 0x2b0   : > { %v887_v28 = vrot.slane %v784_v51, %v1664_v10  ;;  %v919_v31 = vrot.slane %v808_v54, %v1664_v10 }
 0x2b2   : > { %v998_v29 = vsel %vm997_vm9, %v887_v28, %v996_v43  ;;  %v1006_v40 = vsel %vm997_vm9, %v919_v31, %v1005_v32 }
 0x2b3   : > { %v832_v59 = vpop.permute.xlu1 %831  ;;  %v856_v22 = vpop.permute.xlu0 %855 }
 0x2b4   : > { %v951_v48 = vrot.slane %v832_v59, %v1664_v10  ;;  %v983_v47 = vrot.slane %v856_v22, %v1664_v10 }
 0x2b6   : > { %v1013_v55 = vsel %vm997_vm9, %v951_v48, %v1012_v52  ;;  %v1020_v59 = vsel %vm997_vm9, %v983_v47, %v1019_v62 }
 0x2b7   : > { %v787_v42 = vpop.permute.xlu1 %786  ;;  %v811_v45 = vpop.permute.xlu0 %810 }
 0x2b8   : > { %v891_v44 = vrot.slane %v787_v42, %v1664_v10  ;;  %v923_v37 = vrot.slane %v811_v45, %v1664_v10 }
 0x2ba   : > { %v1000_v51 = vsel %vm999_vm10, %v891_v44, %v998_v29  ;;  %v1007_v30 = vsel %vm999_vm10, %v923_v37, %v1006_v40 }
 0x2bb   : > { %v835_v54 = vpop.permute.xlu1 %834  ;;  %v1027_v41 = vsel %vm1026_vm11, %v1000_v51, 0.0  ;;  %v859_v60 = vpop.permute.xlu0 %858  ;;  %v1030_v53 = vsel %vm1026_vm11, %v1007_v30, 0.0 }
 0x2bc   : > { %v955_v58 = vrot.slane %v835_v54, %v1664_v10  ;;  %1028 = vadd.xlane.f32.xlu1 %v1027_v41  ;;  %v987_v63 = vrot.slane %v859_v60, %v1664_v10  ;;  %1031 = vadd.xlane.f32.xlu0 %v1030_v53 }
 0x2be   : > { %v1014_v3 = vsel %vm999_vm10, %v955_v58, %v1013_v55  ;;  %v1021_v15 = vsel %vm999_vm10, %v987_v63, %v1020_v59 }
 0x2bf   : > { %v1033_v8 = vsel %vm1026_vm11, %v1014_v3, 0.0  ;;  %v1036_v19 = vsel %vm1026_vm11, %v1021_v15, 0.0  ;;  %v1051_v10 = vpop.permute.xlu1 %1050  ;;  %v1047_v21 = vpop.permute.xlu0 %1046 }
 0x2c0   : > { %1034 = vadd.xlane.f32.xlu0 %v1033_v8  ;;  %1037 = vadd.xlane.f32.xlu1 %v1036_v19 }
 0x2d1   : > { %1054 = vbcast.lane.b32.xlu1 %v1727_v57, 272 }
 0x2d6   : > { %1058 = vbcast.lane.b32.xlu0 %v1727_v57, 280 }
 0x349   : > { %v1029_v22 = vpop.xlane.xlu1 %1028  ;;  %v1032_v23 = vpop.xlane.xlu0 %1031 }
 0x34a   : > { %v1064_v61 = vadd.f32 %v1047_v21, %v1029_v22  ;;  %v1065_v14 = vadd.f32 %v1051_v10, %v1032_v23 }
 0x34c   : > { %v1242_v28 = vmul.f32 -1.442695, %v1064_v61  ;;  %v1243_v25 = vmul.f32 -1.442695, %v1065_v14 }
 0x34d   : > { %v1038_v26 = vpop.xlane.xlu1 %1037  ;;  %v1035_v27 = vpop.xlane.xlu0 %1034 }
 0x34e   : > { %1306 = vpow2.f32 %v1242_v28 }
 0x34f   : > { %1308 = vpow2.f32 %v1243_v25 }
 0x351   : > { %v1055_v31 = vpop.permute.xlu1 %1054  ;;  %v1059_v35 = vpop.permute.xlu0 %1058 }
 0x352   : > { %v1066_v36 = vadd.f32 %v1055_v31, %v1035_v27  ;;  %v1067_v38 = vadd.f32 %v1059_v35, %v1038_v26 }
 0x354   : > { %v1244_v39 = vmul.f32 -1.442695, %v1066_v36  ;;  %v1245_v42 = vmul.f32 -1.442695, %v1067_v38 }
 0x356   : > { %1310 = vpow2.f32 %v1244_v39 }
 0x357   : > { %1312 = vpow2.f32 %v1245_v42 }
 0x358   : > { %v1307_v57 = vpop.eup %1306 }
 0x359   : > { %v1309_v43 = vpop.eup %1308  ;;  %v1080_v32 = vadd.f32 1.0, %v1307_v57 }
 0x35a   : > { %v1081_v34 = vadd.f32 1.0, %v1309_v43 }
 0x35b   : > { %1314 = vrcp.f32 %v1080_v32 }
 0x35c   : > { %1316 = vrcp.f32 %v1081_v34 }
 0x360   : > { %v1311_v44 = vpop.eup %1310 }
 0x361   : > { %v1313_v45 = vpop.eup %1312  ;;  %v1082_v46 = vadd.f32 1.0, %v1311_v44 }
 0x362   : > { %v1083_v48 = vadd.f32 1.0, %v1313_v45 }
 0x363   : > { %1318 = vrcp.f32 %v1082_v46 }
 0x364   : > { %1320 = vrcp.f32 %v1083_v48 }
 0x365   : > { %v1315_v37 = vpop.eup %1314 }
 0x366   : > { %v1317_v29 = vpop.eup %1316  ;;  %1094 = vperm.xlu1 %1305, %v1315_v37  }
 0x367   : > { %1099 = vperm.xlu0 %1304, %v1317_v29  }
 0x36d   : > { %v1319_v50 = vpop.eup %1318 }
 0x36e   : > { %v1321_v47 = vpop.eup %1320  ;;  %1104 = vperm.xlu1 %1305, %v1319_v50  }
 0x36f   : > { %1109 = vperm.xlu0 %1304, %v1321_v47  }
 0x3e5   : > { %v1095_v51 = vpop.permute.xlu1 %1094 }
 0x3e6   : > { %v1112_v40 = vmul.f32 %v1095_v51, %v1579_v4  ;;  %v1113_v49 = vmul.f32 %v1095_v51, %v1581_v5  ;;  %v1114_v33 = vmul.f32 %v1095_v51, %v1585_v7  ;;  %v1115_v54 = vmul.f32 %v1095_v51, %v1592_v11  ;;  %v1100_v41 = vpop.permute.xlu0 %1099 }
 0x3e7   : > { %v1116_v30 = vmul.f32 %v1100_v41, %v1601_v16  ;;  %v1117_v56 = vmul.f32 %v1100_v41, %v1603_v17  ;;  %v1118_v52 = vmul.f32 %v1100_v41, %v1605_v18  ;;  %v1119_v58 = vmul.f32 %v1100_v41, %v1614_v24 }
 0x3e8   : > { %1128 = vst [vmem:[%s242_s29] sm:$0xff] %v1112_v40  ;;  %1129 = vst [vmem:[%s242_s29 + $0x8] sm:$0xff] %v1113_v49 }
 0x3e9   : > { %1130 = vst [vmem:[%s242_s29 + $0x10] sm:$0xff] %v1114_v33  ;;  %1131 = vst [vmem:[%s242_s29 + $0x18] sm:$0xff] %v1115_v54 }
 0x3ea   : > { %1132 = vst [vmem:[%s242_s29 + $0x20] sm:$0xff] %v1116_v30  ;;  %1133 = vst [vmem:[%s242_s29 + $0x28] sm:$0xff] %v1117_v56 }
 0x3eb   : > { %1134 = vst [vmem:[%s242_s29 + $0x30] sm:$0xff] %v1118_v52  ;;  %1135 = vst [vmem:[%s242_s29 + $0x38] sm:$0xff] %v1119_v58 }
 0x3ed   : > { %v1105_v4 = vpop.permute.xlu1 %1104 }
 0x3ee   : > { %v1120_v5 = vmul.f32 %v1105_v4, %v1571_v0  ;;  %v1121_v7 = vmul.f32 %v1105_v4, %v1573_v1  ;;  %v1122_v11 = vmul.f32 %v1105_v4, %v1575_v2  ;;  %v1123_v16 = vmul.f32 %v1105_v4, %v1583_v6  ;;  %v1110_v17 = vpop.permute.xlu0 %1109 }
 0x3ef   : > { %v1124_v0 = vmul.f32 %v1110_v17, %v1589_v9  ;;  %v1125_v1 = vmul.f32 %v1110_v17, %v1594_v12  ;;  %v1126_v2 = vmul.f32 %v1110_v17, %v1596_v13  ;;  %v1127_v6 = vmul.f32 %v1110_v17, %v1608_v20 }
 0x3f0   : > { %1136 = vst [vmem:[%s242_s29 + $0x40] sm:$0xff] %v1120_v5  ;;  %1137 = vst [vmem:[%s242_s29 + $0x48] sm:$0xff] %v1121_v7 }
 0x3f1   : > { %1138 = vst [vmem:[%s242_s29 + $0x50] sm:$0xff] %v1122_v11  ;;  %1139 = vst [vmem:[%s242_s29 + $0x58] sm:$0xff] %v1123_v16 }
 0x3f2   : > { %1140 = vst [vmem:[%s242_s29 + $0x60] sm:$0xff] %v1124_v0  ;;  %1141 = vst [vmem:[%s242_s29 + $0x68] sm:$0xff] %v1125_v1 }
 0x3f3   : > { %1142 = vst [vmem:[%s242_s29 + $0x70] sm:$0xff] %v1126_v2  ;;  %1143 = vst [vmem:[%s242_s29 + $0x78] sm:$0xff] %v1127_v6 }
 0x3f4   : > { %1365 = shalt.err (!%p1362_p2)
}
 0x3f5   : > { %s1366_s11 = scalar_lea.hbm %s1833_s16, 2048  ;;  %s1370_s26 = scalar_lea.hbm %s1888_s5, 4096 }
 0x3f6   : > { %p1367_p4 = scmp.ne.s32.totalorder %s1833_s16, %s1366_s11  ;;  %p1371_p9 = scmp.lt.u32.totalorder %s1833_s16, %s1888_s5 }
 0x3f7   : > { %p1372_p1 = scmp.lt.u32.totalorder %s1370_s26, %s1366_s11  ;;  %p1374_p6 = scmp.lt.u32.totalorder %s1366_s11, %s1833_s16 }
 0x3f8   : > { %p1368_p5 = pnand %p1367_p4, %p1895_p11 }
 0x3f9   : > { %p1373_p3 = por %p1372_p1, %p1371_p9 }
 0x3fa   : > { %p1369_p7 = pneg %p1368_p5 }
 0x3fb   : > { %p1375_p12 = por %p1374_p6, %p1373_p3 }
 0x3fd   : > { %p1376_p13 = pnand %p1375_p12, %p1369_p7 }
 0x3ff   : > { %1379 = shalt.err (!%p1376_p13)
}
 0x400   : > { %s1425_s12 = smov 512   ;;  %s1426_s25 = smov 32  }
 0x401   : > { %1255 = dma.vmem_to_hbm [thread:$0]  (%p1895_p11), %s1835_s14, 2048, %s1833_s16, %s1145_s22, %s1425_s12, %s1425_s12, %s1426_s25  }
 0x402 PF: > { %s1173_s15 = sand.u32 1, %s1406_s18   ;;  %p1896_p8 = scmp.ne.s32.totalorder %s1893_s6, 0 }
 0x403   : > { %p1897_p10 = scmp.ge.s32.totalorder %s1418_s21, 2  ;;  %s1174_s8 = scalar_lea.sflag [#allocation4], %s1173_s15 }
 0x405   : > { %p1262_p0 = pnand %p1897_p10, %p1896_p8 }
 0x407   : > { %1401 = dma.done.wait (!%p1262_p0), %s1174_s8, 2048  }
 0x408   : > { %1403 = vsyncadd (!%p1262_p0), %s1174_s8, 4294965248  ;;  %p18_p2 = scmp.ge.s32.totalorder %s1482_s24, 4   ;;  %s1898_s18 = smov %s1410_s19 }
 0x409   : > { %s1899_s19 = smov %s1414_s20  ;;  %s1900_s20 = smov %s1494_s27 }
 0x40a   : > { %s1901_s21 = smov %s1482_s24  ;;  %20 = sbr.rel (!%p18_p2) target bundleno = 5 (0x5), region = 85 }
 0x411   :  { %1179 = vsyncpa [#allocation3], 1 }
 0x412   :  { %1181 = vsyncpa [#allocation3 + $0x1], 1 }
 0x413   :  { %1182 = vsyncpa [#allocation4], 1 }
 0x414   :  { %1184 = vsyncpa [#allocation4 + $0x1], 1 }

</bundles_post_ra>
